<compile_context>
chip_gen: v7x
topology: tpu7x:2x2x1
jax: 0.10.0
libtpu: 0.0.40
codegen_flags: <defaults>
</compile_context>

<pallas_src>
import jax
import jax.numpy as jnp
from jax import lax
from jax.experimental import pallas as pl
from jax.experimental.pallas import tpu as pltpu


BN_EPS = 1e-3        # nn.BatchNorm1d(..., eps=0.001) in the PyTorch module
NEG_SLOPE = 0.2      # LeakyReLU negative_slope
LANE = 128


def _round_up(n, m):
    return ((n + m - 1) // m) * m


# ---------------------------------------------------------------------------
# Kernel: one (TB, F0p) batch tile ->  (TB, F3p) output tile.
# BN is pre-folded; dropout is identity (eval), so body is:
#   2x (bf16 matmul -> f32 bias -> LeakyReLU) -> bf16 matmul -> f32 bias
# ---------------------------------------------------------------------------
def _encoder_kernel(x_ref, w0_ref, b0_ref, w1_ref, b1_ref, wo_ref, bo_ref, o_ref):
    x = x_ref[...]                                            # (TB, F0p) bf16

    h = jnp.dot(x, w0_ref[...], preferred_element_type=jnp.float32) + b0_ref[...]
    h = jnp.maximum(h, NEG_SLOPE * h)                         # LeakyReLU(0.2)

    h = jnp.dot(h.astype(jnp.bfloat16), w1_ref[...],
                preferred_element_type=jnp.float32) + b1_ref[...]
    h = jnp.maximum(h, NEG_SLOPE * h)                         # LeakyReLU(0.2)

    out = jnp.dot(h.astype(jnp.bfloat16), wo_ref[...],
                  preferred_element_type=jnp.float32) + bo_ref[...]
    o_ref[...] = out                                          # lane-dense f32 store


# ---------------------------------------------------------------------------
# One-time parameter preparation: fold BN(eval) into Linear, pad to 128 lanes,
# cast weights to bf16 (biases stay f32).
# ---------------------------------------------------------------------------
def prepare_params(params, features):
    f0, f1, f2, f3 = features
    f0p, f1p, f2p, f3p = (_round_up(f, LANE) for f in features)

    def fold(w, b, g, beta, m, v):
        s = g * lax.rsqrt(v + BN_EPS)                # (1, n_out)
        return w * s, (b - m) * s + beta

    w0, b0 = fold(params["w0"], params["b0"], params["g0"],
                  params["beta0"], params["m0"], params["v0"])
    w1, b1 = fold(params["w1"], params["b1"], params["g1"],
                  params["beta1"], params["m1"], params["v1"])
    wo, bo = params["wo"], params["bo"]

    def pad2(a, rows, cols):
        return jnp.pad(a, ((0, rows - a.shape[0]), (0, cols - a.shape[1])))

    return dict(
        w0=pad2(w0, f0p, f1p).astype(jnp.bfloat16), b0=pad2(b0, 1, f1p),
        w1=pad2(w1, f1p, f2p).astype(jnp.bfloat16), b1=pad2(b1, 1, f2p),
        wo=pad2(wo, f2p, f3p).astype(jnp.bfloat16), bo=pad2(bo, 1, f3p),
    )


# ---------------------------------------------------------------------------
# Wrapper: batch-tiled pallas_call. Weights stay VMEM-resident across the grid
# (index_map -> (0,0)); the x / out batch tiles are pipelined.
# ---------------------------------------------------------------------------
def encoder_forward(x, prepped, features, *, tb=128):
    B, f0 = x.shape
    f3 = features[-1]
    f0p, f1p = prepped["w0"].shape
    f2p = prepped["w1"].shape[1]
    f3p = prepped["wo"].shape[1]

    bp = _round_up(B, tb)
    xp = jnp.pad(x, ((0, bp - B), (0, f0p - f0))).astype(jnp.bfloat16)

    def full(shape):
        return pl.BlockSpec(shape, lambda i: (0, 0))

    out = pl.pallas_call(
        _encoder_kernel,
        out_shape=jax.ShapeDtypeStruct((bp, f3p), jnp.float32),
        grid=(bp // tb,),
        in_specs=[
            pl.BlockSpec((tb, f0p), lambda i: (i, 0)),   # x: batch-tiled
            full((f0p, f1p)), full((1, f1p)),            # layer 0 (BN folded)
            full((f1p, f2p)), full((1, f2p)),            # layer 1 (BN folded)
            full((f2p, f3p)), full((1, f3p)),            # output linear
        ],
        out_specs=pl.BlockSpec((tb, f3p), lambda i: (i, 0)),
        compiler_params=pltpu.CompilerParams(
            dimension_semantics=("parallel",)),          # megacore on v7x
    )(xp, prepped["w0"], prepped["b0"],
      prepped["w1"], prepped["b1"],
      prepped["wo"], prepped["bo"])

    return out[:B, :f3]


# ---------------------------------------------------------------------------
# Deterministic parameter init (PyTorch-like shapes; weights stored (in, out)).
# ---------------------------------------------------------------------------
def init_params(key, features):
    keys = jax.random.split(key, 16)
    f0, f1, f2, f3 = features

    def lin(kw, kb, n_in, n_out):
        bound = 1.0 / jnp.sqrt(n_in)
        w = jax.random.uniform(kw, (n_in, n_out), jnp.float32, -bound, bound)
        b = jax.random.uniform(kb, (1, n_out), jnp.float32, -bound, bound)
        return w, b

    w0, b0 = lin(keys[0], keys[1], f0, f1)
    w1, b1 = lin(keys[2], keys[3], f1, f2)
    wo, bo = lin(keys[4], keys[5], f2, f3)

    g0 = jax.random.uniform(keys[6], (1, f1), jnp.float32, 0.5, 1.5)
    beta0 = jax.random.uniform(keys[7], (1, f1), jnp.float32, -0.5, 0.5)
    m0 = jax.random.uniform(keys[8], (1, f1), jnp.float32, -0.2, 0.2)
    v0 = jax.random.uniform(keys[9], (1, f1), jnp.float32, 0.5, 1.5)

    g1 = jax.random.uniform(keys[10], (1, f2), jnp.float32, 0.5, 1.5)
    beta1 = jax.random.uniform(keys[11], (1, f2), jnp.float32, -0.5, 0.5)
    m1 = jax.random.uniform(keys[12], (1, f2), jnp.float32, -0.2, 0.2)
    v1 = jax.random.uniform(keys[13], (1, f2), jnp.float32, 0.5, 1.5)

    return dict(
        w0=w0, b0=b0, g0=g0, beta0=beta0, m0=m0, v0=v0,
        w1=w1, b1=b1, g1=g1, beta1=beta1, m1=m1, v1=v1,
        wo=wo, bo=bo,
    )


# ---------------------------------------------------------------------------
# References for validation.
# ---------------------------------------------------------------------------
def reference_forward(x, p):
    """Full-precision eval-mode reference (un-folded BN, f32)."""
    h = x @ p["w0"] + p["b0"]
    h = (h - p["m0"]) * lax.rsqrt(p["v0"] + BN_EPS) * p["g0"] + p["beta0"]
    h = jnp.where(h >= 0.0, h, NEG_SLOPE * h)
    h = h @ p["w1"] + p["b1"]
    h = (h - p["m1"]) * lax.rsqrt(p["v1"] + BN_EPS) * p["g1"] + p["beta1"]
    h = jnp.where(h >= 0.0, h, NEG_SLOPE * h)
    return h @ p["wo"] + p["bo"]


def reference_forward_folded(x, prepped, features):
    """Pure-JAX mirror of the kernel math (folded BN, bf16 matmuls)."""
    f3 = features[-1]
    f0p = prepped["w0"].shape[0]
    xp = jnp.pad(x, ((0, 0), (0, f0p - x.shape[1]))).astype(jnp.bfloat16)
    h = jnp.dot(xp, prepped["w0"], preferred_element_type=jnp.float32) + prepped["b0"]
    h = jnp.maximum(h, NEG_SLOPE * h)
    h = jnp.dot(h.astype(jnp.bfloat16), prepped["w1"],
                preferred_element_type=jnp.float32) + prepped["b1"]
    h = jnp.maximum(h, NEG_SLOPE * h)
    out = jnp.dot(h.astype(jnp.bfloat16), prepped["wo"],
                  preferred_element_type=jnp.float32) + prepped["bo"]
    return out[:, :f3]


if __name__ == "__main__":
    # Small shapes consistent with Encoder(features=[f0, f1, f2, f3]).
    features = [128, 64, 32, 8]
    batch = 256          # two 128-row batch tiles -> exercises the grid

    key = jax.random.PRNGKey(0)
    k_x, k_p = jax.random.split(key)
    x = jax.random.normal(k_x, (batch, features[0]), jnp.float32)

    params = init_params(k_p, features)
    prepped = prepare_params(params, features)   # one-time fold/pad/bf16 cast

    out = encoder_forward(x, prepped, features, tb=128)
    out = jax.block_until_ready(out)
    assert out.shape == (batch, features[-1]), out.shape

    # Tight check vs. a pure-JAX mirror of the kernel math (same bf16 fold).
    ref_mirror = reference_forward_folded(x, prepped, features)
    assert jnp.allclose(out, ref_mirror, atol=2e-3, rtol=2e-3), \
        "mismatch vs bf16-folded reference"

    # Loose check vs. the full-precision eval-mode reference (bf16 tolerance).
    ref_f32 = reference_forward(x, params)
    assert jnp.allclose(out, ref_f32, atol=1e-1, rtol=1e-1), \
        "mismatch vs f32 reference"

    print("KERNEL_OK")
</pallas_src>

<mosaic_0001>
module attributes {stable_mosaic.version = 11 : i64} {
  func.func @_encoder_kernel(%arg0: i32, %arg1: memref<128x128xbf16, #tpu.memory_space<vmem>>, %arg2: memref<128x128xbf16, #tpu.memory_space<vmem>>, %arg3: memref<1x128xf32, #tpu.memory_space<vmem>>, %arg4: memref<128x128xbf16, #tpu.memory_space<vmem>>, %arg5: memref<1x128xf32, #tpu.memory_space<vmem>>, %arg6: memref<128x128xbf16, #tpu.memory_space<vmem>>, %arg7: memref<1x128xf32, #tpu.memory_space<vmem>>, %arg8: memref<128x128xf32, #tpu.memory_space<vmem>>) attributes {dimension_semantics = [#tpu.dimension_semantics<parallel>], iteration_bounds = array<i64: 2>, scalar_prefetch = 0 : i64, scratch_operands = 0 : i64, tpu.core_type = #tpu.core_type<tc>, window_params = [{transform_indices = @transform_0, window_bounds = array<i64: 128, 128>}, {pipeline_mode = #tpu.pipeline_mode<synchronous>, transform_indices = @transform_1, window_bounds = array<i64: 128, 128>}, {pipeline_mode = #tpu.pipeline_mode<synchronous>, transform_indices = @transform_2, window_bounds = array<i64: 1, 128>}, {pipeline_mode = #tpu.pipeline_mode<synchronous>, transform_indices = @transform_3, window_bounds = array<i64: 128, 128>}, {pipeline_mode = #tpu.pipeline_mode<synchronous>, transform_indices = @transform_4, window_bounds = array<i64: 1, 128>}, {pipeline_mode = #tpu.pipeline_mode<synchronous>, transform_indices = @transform_5, window_bounds = array<i64: 128, 128>}, {pipeline_mode = #tpu.pipeline_mode<synchronous>, transform_indices = @transform_6, window_bounds = array<i64: 1, 128>}, {transform_indices = @transform_7, window_bounds = array<i64: 128, 128>}]} {
    %c0 = arith.constant 0 : index
    %c0_0 = arith.constant 0 : index
    %0 = vector.load %arg1[%c0, %c0_0] : memref<128x128xbf16, #tpu.memory_space<vmem>>, vector<128x128xbf16>
    %c0_1 = arith.constant 0 : index
    %c0_2 = arith.constant 0 : index
    %1 = vector.load %arg2[%c0_1, %c0_2] : memref<128x128xbf16, #tpu.memory_space<vmem>>, vector<128x128xbf16>
    %cst = arith.constant dense<0.000000e+00> : vector<128x128xf32>
    %2 = tpu.matmul %0, %1, %cst {dimension_numbers = #tpu.dot_dimension_numbers<[1], [0], [0], [1], [0, 0, 1, 1], [], []>} : vector<128x128xbf16>, vector<128x128xbf16>, vector<128x128xf32> -> vector<128x128xf32>
    %c0_3 = arith.constant 0 : index
    %c0_4 = arith.constant 0 : index
    %3 = vector.load %arg3[%c0_3, %c0_4] : memref<1x128xf32, #tpu.memory_space<vmem>>, vector<1x128xf32>
    %4 = vector.broadcast %3 : vector<1x128xf32> to vector<128x128xf32>
    %5 = arith.addf %2, %4 : vector<128x128xf32>
    %cst_5 = arith.constant 2.000000e-01 : f32
    %6 = vector.broadcast %cst_5 : f32 to vector<128x128xf32>
    %7 = arith.mulf %6, %5 : vector<128x128xf32>
    %8 = arith.maximumf %5, %7 : vector<128x128xf32>
    %9 = arith.truncf %8 : vector<128x128xf32> to vector<128x128xbf16>
    %c0_6 = arith.constant 0 : index
    %c0_7 = arith.constant 0 : index
    %10 = vector.load %arg4[%c0_6, %c0_7] : memref<128x128xbf16, #tpu.memory_space<vmem>>, vector<128x128xbf16>
    %cst_8 = arith.constant dense<0.000000e+00> : vector<128x128xf32>
    %11 = tpu.matmul %9, %10, %cst_8 {dimension_numbers = #tpu.dot_dimension_numbers<[1], [0], [0], [1], [0, 0, 1, 1], [], []>} : vector<128x128xbf16>, vector<128x128xbf16>, vector<128x128xf32> -> vector<128x128xf32>
    %c0_9 = arith.constant 0 : index
    %c0_10 = arith.constant 0 : index
    %12 = vector.load %arg5[%c0_9, %c0_10] : memref<1x128xf32, #tpu.memory_space<vmem>>, vector<1x128xf32>
    %13 = vector.broadcast %12 : vector<1x128xf32> to vector<128x128xf32>
    %14 = arith.addf %11, %13 : vector<128x128xf32>
    %cst_11 = arith.constant 2.000000e-01 : f32
    %15 = vector.broadcast %cst_11 : f32 to vector<128x128xf32>
    %16 = arith.mulf %15, %14 : vector<128x128xf32>
    %17 = arith.maximumf %14, %16 : vector<128x128xf32>
    %18 = arith.truncf %17 : vector<128x128xf32> to vector<128x128xbf16>
    %c0_12 = arith.constant 0 : index
    %c0_13 = arith.constant 0 : index
    %19 = vector.load %arg6[%c0_12, %c0_13] : memref<128x128xbf16, #tpu.memory_space<vmem>>, vector<128x128xbf16>
    %cst_14 = arith.constant dense<0.000000e+00> : vector<128x128xf32>
    %20 = tpu.matmul %18, %19, %cst_14 {dimension_numbers = #tpu.dot_dimension_numbers<[1], [0], [0], [1], [0, 0, 1, 1], [], []>} : vector<128x128xbf16>, vector<128x128xbf16>, vector<128x128xf32> -> vector<128x128xf32>
    %c0_15 = arith.constant 0 : index
    %c0_16 = arith.constant 0 : index
    %21 = vector.load %arg7[%c0_15, %c0_16] : memref<1x128xf32, #tpu.memory_space<vmem>>, vector<1x128xf32>
    %22 = vector.broadcast %21 : vector<1x128xf32> to vector<128x128xf32>
    %23 = arith.addf %20, %22 : vector<128x128xf32>
    %c0_17 = arith.constant 0 : index
    %c0_18 = arith.constant 0 : index
    %24 = vector.load %arg8[%c0_17, %c0_18] : memref<128x128xf32, #tpu.memory_space<vmem>>, vector<128x128xf32>
    tpu.vector_store %arg8[%c0_17, %c0_18], %23 {strides = array<i32>} : memref<128x128xf32, #tpu.memory_space<vmem>>, vector<128x128xf32>,
    return
  }
  func.func @transform_0(%arg0: i32) -> (i32, i32) {
    %c0_i32 = arith.constant 0 : i32
    %c0_i32_0 = arith.constant 0 : i32
    return %arg0, %c0_i32 : i32, i32
  }
  func.func @transform_1(%arg0: i32) -> (i32, i32) {
    %c0_i32 = arith.constant 0 : i32
    %c0_i32_0 = arith.constant 0 : i32
    %c0_i32_1 = arith.constant 0 : i32
    return %c0_i32, %c0_i32_0 : i32, i32
  }
  func.func @transform_2(%arg0: i32) -> (i32, i32) {
    %c0_i32 = arith.constant 0 : i32
    %c0_i32_0 = arith.constant 0 : i32
    %c0_i32_1 = arith.constant 0 : i32
    return %c0_i32, %c0_i32_0 : i32, i32
  }
  func.func @transform_3(%arg0: i32) -> (i32, i32) {
    %c0_i32 = arith.constant 0 : i32
    %c0_i32_0 = arith.constant 0 : i32
    %c0_i32_1 = arith.constant 0 : i32
    return %c0_i32, %c0_i32_0 : i32, i32
  }
  func.func @transform_4(%arg0: i32) -> (i32, i32) {
    %c0_i32 = arith.constant 0 : i32
    %c0_i32_0 = arith.constant 0 : i32
    %c0_i32_1 = arith.constant 0 : i32
    return %c0_i32, %c0_i32_0 : i32, i32
  }
  func.func @transform_5(%arg0: i32) -> (i32, i32) {
    %c0_i32 = arith.constant 0 : i32
    %c0_i32_0 = arith.constant 0 : i32
    %c0_i32_1 = arith.constant 0 : i32
    return %c0_i32, %c0_i32_0 : i32, i32
  }
  func.func @transform_6(%arg0: i32) -> (i32, i32) {
    %c0_i32 = arith.constant 0 : i32
    %c0_i32_0 = arith.constant 0 : i32
    %c0_i32_1 = arith.constant 0 : i32
    return %c0_i32, %c0_i32_0 : i32, i32
  }
  func.func @transform_7(%arg0: i32) -> (i32, i32) {
    %c0_i32 = arith.constant 0 : i32
    %c0_i32_0 = arith.constant 0 : i32
    return %arg0, %c0_i32 : i32, i32
  }
}

</mosaic_0001>

<bundles_post_ra>
// kernel: tpu_custom_call.1
= control target key start
LH: loop header
LB: loop body
LE: loop exit
PB: predicated region body
PF: predicated region fallthrough
CT: control target
= control target key end

     0   :  { %12 = vsyncpa [#allocation3], 0  ;;  %s2057_s0 = inlined_call_operand.hbm [shape: bf16[256,128], index: 0, kind: input, shape index: {}]   ;;  %s2058_s1 = inlined_call_operand.hbm [shape: bf16[128,128], index: 1, kind: input, shape index: {}]   ;;  %s2059_s2 = inlined_call_operand.vmem [shape: f32[1,128], index: 2, kind: input, shape index: {}]   ;;  %s2060_s3 = inlined_call_operand.hbm [shape: bf16[128,128], index: 3, kind: input, shape index: {}]   ;;  %s2061_s4 = inlined_call_operand.vmem [shape: f32[1,128], index: 4, kind: input, shape index: {}]   ;;  %s2062_s5 = inlined_call_operand.hbm [shape: bf16[128,128], index: 5, kind: input, shape index: {}]   ;;  %s2063_s6 = inlined_call_operand.vmem [shape: f32[1,128], index: 6, kind: input, shape index: {}]   ;;  %s2064_s7 = inlined_call_operand.hbm [shape: f32[256,128], index: 7, kind: output, shape index: {}]  }
   0x1   :  { %14 = vsyncpa [#allocation3 + $0x1], 0 }
   0x2   :  { %15 = vsyncpa [#allocation6], 0 }
   0x3   :  { %16 = vsyncpa [#allocation9], 0 }
   0x4   :  { %17 = vsyncpa [#allocation4], 0 }
   0x5   :  { %19 = vsyncpa [#allocation4 + $0x1], 0  ;;  %s1693_s24 = smov 0   ;;  %s1695_s25 = smov 0  }
   0x6   :  { %s1697_s26 = smov 0   ;;  %s1699_s27 = smov 0  }
   0x7 LB: > { %s1714_s28 = sadd.s32 4294967295, %s1642_s27   ;;  %s1124_s29 = sadd.s32 4294967294, %s1642_s27   ;;  %s1642_s27 = sphi %s1699_s27, %s2090_s27   ;;  %s1638_s26 = sphi %s1697_s26, %s2089_s26   ;;  %s1634_s25 = sphi %s1695_s25, %s2088_s25   ;;  %s1630_s24 = sphi %s1693_s24, %s2087_s24  }
   0x8   : > { %p45_p0 = scmp.ne.s32.totalorder %s1634_s25, %s1630_s24  ;;  %p2065_p1 = scmp.eq.s32.totalorder %s1714_s28, 0 }
   0x9   : > { %p201_p3 = scmp.eq.s32.totalorder %s1124_s29, 1  ;;  %p1125_p5 = scmp.ge.s32.totalorder %s1642_s27, 1 }
   0xa   : > { %p1723_p4 = por %p2065_p1, %p45_p0  ;;  %p208_p7 = scmp.lt.s32.totalorder %s1642_s27, 3 }
   0xb   : > { %p1728_p6 = por %p201_p3, %p45_p0  ;;  %s1644_s10 = smov [#allocation5]  }
   0xc   : > { %s2069_s30 = scalar_select %p1723_p4, 1, 0 }
   0xd   : > { %s2070_s8 = scalar_select %p1728_p6, 1, 0 }
   0xe   : > { %p1733_p8 = pnand %p1125_p5, %p208_p7  ;;  %s220_s11 = sshll.u32 %s1644_s10, 4  ;;  %s1737_s11 = int_to_ptr.vmem [resolvable:$true] %s220_s11 }
   0xf   : > { %2071 = sst [smem:[#allocation15_spill]] %s2070_s8  ;;  %s1645_s13 = smov [#allocation7]  }
  0x10   : > { %s2072_s9 = scalar_select %p1733_p8, 1, 0 }
  0x11   : > { %p1357_p9 = pneg %p1733_p8  ;;  %s236_s14 = sshll.u32 %s1645_s13, 4  ;;  %s1748_s14 = int_to_ptr.vmem [resolvable:$true] %s236_s14 }
  0x12   : > { %s1646_s15 = smov [#allocation8]   ;;  %s1454_s19 = scalar_lea.hbm %s2058_s1, 1024 }
  0x13   : > { %p1744_p11 = pnand %p1357_p9, %p2065_p1  ;;  %s1750_s16 = sshll.u32 %s1646_s15, 4  ;;  %s253_s16 = int_to_ptr.vmem [resolvable:$true] %s1750_s16 }
  0x14   : > { %p1455_p12 = scmp.ne.s32.totalorder %s2058_s1, %s1454_s19  ;;  %p1461_p5 = scmp.lt.u32.totalorder %s1454_s19, %s2058_s1 }
  0x15   : > { %p1760_p13 = pneg %p1744_p11 }
  0x17   : > { %p1457_p0 = pnand %p1760_p13, %p1455_p12 }
  0x19   : > { %p1458_p3 = pneg %p1457_p0 }
  0x1b   : > { %p1463_p7 = pnand %p1461_p5, %p1458_p3 }
  0x1d   : > { %1466 = shalt.err (!%p1463_p7)
}
  0x1e   : > { %s1467_s10 = scalar_lea.vmem %s1737_s11, 1024  ;;  %p1475_p2 = scmp.lt.s32.totalorder %s1737_s11, %s1737_s11 }
  0x1f   : > { %p1468_p9 = scmp.ne.s32.totalorder %s1737_s11, %s1467_s10  ;;  %p1476_p6 = scmp.lt.s32.totalorder %s1467_s10, %s1467_s10 }
  0x21   : > { %p1470_p10 = pnand %p1468_p9, %p1760_p13  ;;  %p1477_p12 = por %p1476_p6, %p1475_p2 }
  0x23   : > { %p1471_p1 = pneg %p1470_p10 }
  0x25   : > { %p1478_p0 = pnand %p1477_p12, %p1471_p1 }
  0x27   : > { %1481 = shalt.err (!%p1478_p0)
}
  0x28   : > { %s1647_s13 = smov 64   ;;  %s1648_s15 = smov 4  }
  0x29   : > { %1360 = dma.hbm_to_vmem [thread:$0]  (!%p1744_p11), %s2058_s1, 1024, %s1737_s11, [#allocation6], %s1647_s13, %s1647_s13, %s1648_s15  }
  0x2a   : > { %s1482_s21 = scalar_lea.hbm %s2060_s3, 1024 }
  0x2b   : > { %p1483_p1 = scmp.ne.s32.totalorder %s2060_s3, %s1482_s21  ;;  %p1489_p10 = scmp.lt.u32.totalorder %s1482_s21, %s2060_s3 }
  0x2d   : > { %p1485_p2 = pnand %p1483_p1, %p1760_p13 }
  0x2f   : > { %p1486_p6 = pneg %p1485_p2 }
  0x31   : > { %p1491_p3 = pnand %p1489_p10, %p1486_p6 }
  0x33   : > { %1494 = shalt.err (!%p1491_p3)
}
  0x34   : > { %s1495_s11 = scalar_lea.vmem %s1748_s14, 1024  ;;  %p1503_p12 = scmp.lt.s32.totalorder %s1748_s14, %s1748_s14 }
  0x35   : > { %p1496_p5 = scmp.ne.s32.totalorder %s1748_s14, %s1495_s11  ;;  %p1504_p0 = scmp.lt.s32.totalorder %s1495_s11, %s1495_s11 }
  0x37   : > { %p1498_p7 = pnand %p1496_p5, %p1760_p13  ;;  %p1505_p1 = por %p1504_p0, %p1503_p12 }
  0x39   : > { %p1499_p9 = pneg %p1498_p7 }
  0x3b   : > { %p1506_p2 = pnand %p1505_p1, %p1499_p9 }
  0x3d   : > { %1509 = shalt.err (!%p1506_p2)
}
  0x3e   : > { %1363 = dma.hbm_to_vmem [thread:$0]  (!%p1744_p11), %s2060_s3, 1024, %s1748_s14, [#allocation6], %s1647_s13, %s1647_s13, %s1648_s15  }
  0x3f   : > { %s1510_s20 = scalar_lea.hbm %s2062_s5, 1024 }
  0x40   : > { %p1511_p6 = scmp.ne.s32.totalorder %s2062_s5, %s1510_s20  ;;  %p1517_p5 = scmp.lt.u32.totalorder %s1510_s20, %s2062_s5 }
  0x42   : > { %p1513_p10 = pnand %p1511_p6, %p1760_p13 }
  0x44   : > { %p1514_p3 = pneg %p1513_p10 }
  0x46   : > { %p1519_p7 = pnand %p1517_p5, %p1514_p3 }
  0x48   : > { %1522 = shalt.err (!%p1519_p7)
}
  0x49   : > { %s1523_s11 = scalar_lea.vmem %s253_s16, 1024  ;;  %p1531_p1 = scmp.lt.s32.totalorder %s253_s16, %s253_s16 }
  0x4a   : > { %p1524_p9 = scmp.ne.s32.totalorder %s253_s16, %s1523_s11  ;;  %p1532_p2 = scmp.lt.s32.totalorder %s1523_s11, %s1523_s11 }
  0x4c   : > { %p1526_p12 = pnand %p1524_p9, %p1760_p13  ;;  %p1533_p4 = por %p1532_p2, %p1531_p1 }
  0x4e   : > { %p1527_p0 = pneg %p1526_p12 }
  0x50   : > { %p1534_p8 = pnand %p1533_p4, %p1527_p0 }
  0x52   : > { %1537 = shalt.err (!%p1534_p8)
}
  0x53   : > { %1366 = dma.hbm_to_vmem [thread:$0]  (!%p1744_p11), %s2062_s5, 1024, %s253_s16, [#allocation9], %s1647_s13, %s1647_s13, %s1648_s15  }
  0x54   : > { %s1833_s22 = sadd.s32 1, %s1642_s27   ;;  %s32_s17 = sadd.s32 1, %s1638_s26 }
  0x55   : > { %s29_s12 = ssub.s32 %s1642_s27, %s1833_s22  ;;  %p39_p8 = scmp.ne.s32.totalorder %s1638_s26, %s1634_s25 }
  0x56   : > { %p30_p4 = scmp.eq.s32.totalorder %s29_s12, 0  ;;  %p40_p13 = scmp.eq.s32.totalorder %s1642_s27, 0 }
  0x57   : > { %p1378_p6 = scmp.lt.s32.totalorder %s1642_s27, 2  ;;  %p2075_p3 = scmp.eq.s32.totalorder %s1714_s28, 1 }
  0x58   : > { %s1843_s18 = scalar_select %p30_p4, %s1638_s26, %s32_s17  }
  0x59   : > { %p41_p10 = por %p40_p13, %p39_p8  ;;  %p1847_p5 = por %p2075_p3, %p39_p8 }
  0x5a   : > { %s269_s20 = sand.u32 1, %s1638_s26   ;;  %s1179_s21 = sshll.u32 %s1642_s27, 10 }
  0x5b   : > { %s1130_s16 = sshll.u32 %s269_s20, 6  ;;  %s1856_s10 = scalar_lea.hbm %s2057_s0, %s1179_s21 }
  0x5c   : > { %s273_s11 = scalar_lea.vmem [#allocation2], %s1130_s16  ;;  %p1858_p11 = pnand %p1378_p6, %p41_p10 }
  0x5d   : > { %s280_s14 = sshll.u32 %s273_s11, 4  ;;  %s1864_s12 = scalar_lea.sflag [#allocation3], %s269_s20  ;;  %s1862_s14 = int_to_ptr.vmem [resolvable:$true] %s280_s14 }
  0x5e   : > { %s1538_s17 = scalar_lea.hbm %s1856_s10, 1024  ;;  %p1540_p9 = pneg %p1858_p11 }
  0x5f   : > { %p1539_p7 = scmp.ne.s32.totalorder %s1856_s10, %s1538_s17  ;;  %s1543_s23 = scalar_lea.hbm %s2057_s0, 2048 }
  0x60   : > { %p1544_p1 = scmp.lt.u32.totalorder %s1856_s10, %s2057_s0  ;;  %p1545_p2 = scmp.lt.u32.totalorder %s1543_s23, %s1538_s17 }
  0x61   : > { %p1541_p12 = pnand %p1540_p9, %p1539_p7  ;;  %p1547_p8 = scmp.lt.u32.totalorder %s1538_s17, %s1856_s10 }
  0x62   : > { %p1546_p4 = por %p1545_p2, %p1544_p1 }
  0x63   : > { %p1542_p0 = pneg %p1541_p12 }
  0x64   : > { %p1548_p13 = por %p1547_p8, %p1546_p4 }
  0x66   : > { %p1549_p6 = pnand %p1548_p13, %p1542_p0 }
  0x68   : > { %1552 = shalt.err (!%p1549_p6)
}
  0x69   : > { %s1553_s20 = scalar_lea.vmem %s1862_s14, 1024  ;;  %s1649_s21 = smov [#allocation2]  }
  0x6a   : > { %p1554_p10 = scmp.ne.s32.totalorder %s1862_s14, %s1553_s20  ;;  %s1558_s16 = sshll.u32 %s1649_s21, 4  ;;  %s1559_s16 = int_to_ptr.vmem [resolvable:$false] %s1558_s16 }
  0x6b   : > { %s1560_s29 = scalar_lea.vmem %s1559_s16, 2048  ;;  %p1561_p12 = scmp.lt.s32.totalorder %s1862_s14, %s1559_s16 }
  0x6c   : > { %p1556_p3 = pnand %p1554_p10, %p1540_p9  ;;  %p1562_p1 = scmp.lt.s32.totalorder %s1560_s29, %s1553_s20 }
  0x6e   : > { %p1557_p7 = pneg %p1556_p3  ;;  %p1563_p2 = por %p1562_p1, %p1561_p12 }
  0x70   : > { %p1564_p4 = pnand %p1563_p2, %p1557_p7 }
  0x72   : > { %1567 = shalt.err (!%p1564_p4)
}
  0x73   : > { %1370 = dma.hbm_to_vmem [thread:$0]  (!%p1858_p11), %s1856_s10, 1024, %s1862_s14, %s1864_s12, %s1647_s13, %s1647_s13, %s1648_s15  }
  0x74   : > { %p2078_p9 = scmp.ne.s32.totalorder %s2072_s9, 0 }
  0x75   : > { %s1898_s17 = sand.u32 (!%p2078_p9), 1, %s1634_s25   ;;  %p2079_p0 = scmp.ne.s32.totalorder (!%p2078_p9), %s2069_s30, 0 }
  0x76   : > { %292 = sbr.rel (%p2078_p9) target bundleno = 870 (0x366), region = 48  ;;  %s1134_s23 = sshll.u32 (!%p2078_p9), %s1898_s17, 6 }
  0x77   : > { %s295_s11 = scalar_lea.sflag (!%p2078_p9), [#allocation3], %s1898_s17  ;;  %s1902_s20 = scalar_lea.vmem (!%p2078_p9), [#allocation2], %s1134_s23 }
  0x7d   : > { %1613 = dma.done.wait (%p2079_p0), %s295_s11, 1024  }
  0x7e   : > { %1615 = vsyncadd (%p2079_p0), %s295_s11, 4294966272  ;;  %p2080_p11 = scmp.eq.s32.totalorder %s1714_s28, 0 }
  0x80   : > { %1617 = dma.done.wait (%p2080_p11), [#allocation6], 2048   ;;  %p2081_p8 = pmov %p2080_p11 }
  0x82   : > { %1619 = vsyncadd (%p2081_p8), [#allocation6], 4294965248  ;;  %p2082_p13 = pmov %p2081_p8 }
  0x83   : > { %p2083_p6 = pmov %p2081_p8 }
  0x84   : > { %1621 = dma.done.wait (%p2082_p13), [#allocation9], 1024  }
  0x85   : > { %1623 = vsyncadd (%p2083_p6), [#allocation9], 4294966272  ;;  %v1422_v0 = vld [vmem:[#allocation5] sm:$0xff]   ;;  %v1423_v1 = vld [vmem:[#allocation5 + $0x8] sm:$0xff]   ;;  %s1138_s10 = sshll.u32 %s1898_s17, 7  ;;  %s1180_s21 = sshll.u32 %s1714_s28, 11 }
  0x86   : > { %1229 = vmatprep.subr.bf16.mxu0 %v1422_v0  ;;  %v1424_v2 = vld [vmem:[#allocation5 + $0x10] sm:$0xff]   ;;  %v1425_v3 = vld [vmem:[#allocation5 + $0x18] sm:$0xff]   ;;  %v1430_v4 = vld [vmem:[%s1902_s20] sm:$0xff]   ;;  %s1988_s12 = scalar_lea.vmem [#allocation10], %s1138_s10  ;;  %s2008_s11 = scalar_lea.hbm %s2064_s7, %s1180_s21 }
  0x87   : > { %1230 = vmatpush3.bf16.msra.mxu0 %v1422_v0  ;;  %1245 = vmatprep.mubr.bf16.mxu0 %v1430_v4  ;;  %v1426_v5 = vld [vmem:[#allocation5 + $0x20] sm:$0xff]   ;;  %v1427_v6 = vld [vmem:[#allocation5 + $0x28] sm:$0xff]   ;;  %v1428_v9 = vld [vmem:[#allocation5 + $0x30] sm:$0xff]   ;;  %s1022_s16 = sshll.u32 %s1988_s12, 4  ;;  %s1009_s28 = scalar_lea.sflag [#allocation4], %s1898_s17  ;;  %s2010_s16 = int_to_ptr.vmem [resolvable:$true] %s1022_s16 }
  0x88   : > { %1231 = vmatprep.subr.bf16.mxu0 %v1423_v1  ;;  %v1438_v7 = vld [vmem:[#allocation7] sm:$0xff]   ;;  %v1439_v8 = vld [vmem:[#allocation7 + $0x8] sm:$0xff]   ;;  %v1440_v10 = vld [vmem:[#allocation7 + $0x10] sm:$0xff]   ;;  %s1650_s30 = smov [#allocation10]  }
  0x89   : > { %1261 = vmatprep.subr.bf16.mxu1 %v1438_v7  ;;  %v1429_v11 = vld [vmem:[#allocation5 + $0x38] sm:$0xff]   ;;  %v1442_v13 = vld [vmem:[#allocation7 + $0x20] sm:$0xff]   ;;  %v1431_v14 = vld [vmem:[%s1902_s20 + $0x8] sm:$0xff]   ;;  %s1572_s9 = sshll.u32 %s1650_s30, 4  ;;  %s1573_s9 = int_to_ptr.vmem [resolvable:$false] %s1572_s9 }
  0x8a   : > { %1262 = vmatpush3.bf16.msra.mxu1 %v1438_v7  ;;  %v1441_v12 = vld [vmem:[#allocation7 + $0x18] sm:$0xff]   ;;  %v1432_v15 = vld [vmem:[%s1902_s20 + $0x10] sm:$0xff]   ;;  %v1434_v17 = vld [vmem:[%s1902_s20 + $0x20] sm:$0xff]   ;;  %s1574_s13 = scalar_lea.vmem %s1573_s9, 4096  ;;  %p1575_p12 = scmp.lt.s32.totalorder %s2010_s16, %s1573_s9 }
  0x8b   : > { %1232 = vmatpush3.bf16.msra.mxu0 %v1423_v1  ;;  %1263 = vmatprep.subr.bf16.mxu1 %v1439_v8  ;;  %v1433_v16 = vld [vmem:[%s1902_s20 + $0x18] sm:$0xff]   ;;  %v1435_v18 = vld [vmem:[%s1902_s20 + $0x28] sm:$0xff]   ;;  %v1436_v19 = vld [vmem:[%s1902_s20 + $0x30] sm:$0xff]  }
  0x8c   : > { %1233 = vmatprep.subr.bf16.mxu0 %v1424_v2  ;;  %v1437_v20 = vld [vmem:[%s1902_s20 + $0x38] sm:$0xff]   ;;  %v1443_v21 = vld [vmem:[#allocation7 + $0x28] sm:$0xff]   ;;  %v1444_v22 = vld [vmem:[#allocation7 + $0x30] sm:$0xff]   ;;  %s1568_s20 = scalar_lea.vmem %s2010_s16, 2048 }
  0x8d   : > { %v1445_v23 = vld [vmem:[#allocation7 + $0x38] sm:$0xff]   ;;  %v1446_v24 = vld [vmem:[#allocation8] sm:$0xff]   ;;  %v1447_v25 = vld [vmem:[#allocation8 + $0x8] sm:$0xff]   ;;  %p1569_p10 = scmp.ne.s32.totalorder %s2010_s16, %s1568_s20  ;;  %p1576_p1 = scmp.lt.s32.totalorder %s1574_s13, %s1568_s20 }
  0x8e   : > { %1264 = vmatpush3.bf16.msra.mxu1 %v1439_v8  ;;  %v1924_v26 = vld [vmem:[#allocation8 + $0x10] sm:$0xff]   ;;  %v1927_v27 = vld [vmem:[#allocation8 + $0x18] sm:$0xff]   ;;  %v1931_v28 = vld [vmem:[#allocation8 + $0x20] sm:$0xff]  }
  0x8f   : > { %1234 = vmatpush3.bf16.msra.mxu0 %v1424_v2  ;;  %1265 = vmatprep.subr.bf16.mxu1 %v1440_v10  ;;  %v1939_v29 = vld [vmem:[%s2059_s2] ss:$0 sm:$0xff]  ;;  %p1570_p3 = pnand %p1569_p10, %p1847_p5  ;;  %p1577_p2 = por %p1576_p1, %p1575_p12 }
  0x90   : > { %1235 = vmatprep.subr.bf16.mxu0 %v1425_v3 }
  0x91   : > { %p1571_p7 = pneg %p1570_p3 }
  0x92   : > { %1266 = vmatpush3.bf16.msra.mxu1 %v1440_v10 }
  0x93   : > { %1236 = vmatpush3.bf16.msra.mxu0 %v1425_v3  ;;  %1267 = vmatprep.subr.bf16.mxu1 %v1441_v12  ;;  %p1578_p4 = pnand %p1577_p2, %p1571_p7 }
  0x94   : > { %1237 = vmatprep.subr.bf16.mxu0 %v1426_v5 }
  0x96   : > { %1268 = vmatpush3.bf16.msra.mxu1 %v1441_v12 }
  0x97   : > { %1238 = vmatpush3.bf16.msra.mxu0 %v1426_v5  ;;  %1269 = vmatprep.subr.bf16.mxu1 %v1442_v13 }
  0x98   : > { %1239 = vmatprep.subr.bf16.mxu0 %v1427_v6 }
  0x9a   : > { %1270 = vmatpush3.bf16.msra.mxu1 %v1442_v13 }
  0x9b   : > { %1240 = vmatpush3.bf16.msra.mxu0 %v1427_v6  ;;  %1271 = vmatprep.subr.bf16.mxu1 %v1443_v21 }
  0x9c   : > { %1241 = vmatprep.subr.bf16.mxu0 %v1428_v9 }
  0x9e   : > { %1272 = vmatpush3.bf16.msra.mxu1 %v1443_v21 }
  0x9f   : > { %1242 = vmatpush3.bf16.msra.mxu0 %v1428_v9  ;;  %1273 = vmatprep.subr.bf16.mxu1 %v1444_v22 }
  0xa0   : > { %1243 = vmatprep.subr.bf16.mxu0 %v1429_v11 }
  0xa2   : > { %1274 = vmatpush3.bf16.msra.mxu1 %v1444_v22 }
  0xa3   : > { %1244 = vmatpush3.bf16.msra.mxu0 %v1429_v11  ;;  %1275 = vmatprep.subr.bf16.mxu1 %v1445_v23 }
  0xa4   : > { %1293 = vmatprep.subr.bf16.mxu0 %v1446_v24 }
  0xa6   : > { %1246 = vmatmul.mubr.bf16.vlgmr.msra.gmra.mrb[0].mxu0 %v1431_v14  ;;  %1276 = vmatpush3.bf16.msra.mxu1 %v1445_v23 }
  0xa7   : > { %1249 = vmatprep.mubr.bf16.mxu0 %v1432_v15  ;;  %1325 = vmatprep.subr.bf16.mxu1 %v1446_v24 }
  0xa8   : > { %1294 = vmatpush3.bf16.msra.mxu0 %v1446_v24 }
  0xa9   : > { %1295 = vmatprep.subr.bf16.mxu0 %v1447_v25 }
  0xac   : > { %1296 = vmatpush3.bf16.msra.mxu0 %v1447_v25 }
  0xad   : > { %1297 = vmatprep.subr.bf16.mxu0 %v1924_v26 }
  0xae   : > { %1250 = vmatmul.mubr.bf16.gmra.mrb[4].mxu0 %v1433_v16 }
  0xaf   : > { %1253 = vmatprep.mubr.bf16.mxu0 %v1434_v17 }
  0xb0   : > { %1298 = vmatpush3.bf16.msra.mxu0 %v1924_v26 }
  0xb1   : > { %1299 = vmatprep.subr.bf16.mxu0 %v1927_v27 }
  0xb4   : > { %1300 = vmatpush3.bf16.msra.mxu0 %v1927_v27 }
  0xb5   : > { %1301 = vmatprep.subr.bf16.mxu0 %v1931_v28 }
  0xb6   : > { %1254 = vmatmul.mubr.bf16.gmra.mrb[8].mxu0 %v1435_v18 }
  0xb7   : > { %1257 = vmatprep.mubr.bf16.mxu0 %v1436_v19 }
  0xb8   : > { %1302 = vmatpush3.bf16.msra.mxu0 %v1931_v28 }
  0xbe   : > { %1258 = vmatmul.mubr.bf16.gmra.mrb[12].mxu0 %v1437_v20 }
 0x179   : > { %v1247_v30 = vpop.f32.mrb[0].mxu0 }
 0x17a   : > { %v522_v31 = vadd.f32 %v1247_v30, %v1939_v29  ;;  %v513_v32 = vpop.f32.mrb[1].mxu0 }
 0x17b   : > { %v514_v33 = vadd.f32 %v1939_v29, %v513_v32  ;;  %v1248_v34 = vpop.f32.mrb[2].mxu0 }
 0x17c   : > { %v578_v35 = vmul.f32 0.2, %v522_v31  ;;  %v525_v36 = vadd.f32 %v1248_v34, %v1939_v29  ;;  %v516_v37 = vpop.f32.mrb[3].mxu0 }
 0x17d   : > { %v576_v38 = vmul.f32 0.2, %v514_v33  ;;  %v517_v39 = vadd.f32 %v1939_v29, %v516_v37 }
 0x17e   : > { %v579_v40 = vmul.f32 0.2, %v525_v36  ;;  %v594_v42 = vmax.f32 %v522_v31, %v578_v35 }
 0x17f   : > { %v577_v41 = vmul.f32 0.2, %v517_v39  ;;  %v592_v45 = vmax.f32 %v514_v33, %v576_v38 }
 0x180   : > { %v595_v43 = vmax.f32 %v525_v36, %v579_v40  ;;  %v1451_v40 = vld [vmem:[#allocation8 + $0x28] sm:$0xff]  }
 0x181   : > { %v1251_v44 = vpop.f32.mrb[4].mxu0  ;;  %v593_v46 = vmax.f32 %v517_v39, %v577_v41  ;;  %1303 = vmatprep.subr.bf16.mxu0 %v1451_v40  ;;  %v1453_v41 = vld [vmem:[#allocation8 + $0x38] sm:$0xff]  }
 0x182   : > { %v538_v47 = vadd.f32 %v1251_v44, %v1939_v29  ;;  %v529_v48 = vpop.f32.mrb[5].mxu0  ;;  %v609_v49 = vpack.c.bf16 %v595_v43, %v594_v42  ;;  %1304 = vmatpush3.bf16.msra.mxu0 %v1451_v40 }
 0x183   : > { %v530_v50 = vadd.f32 %v1939_v29, %v529_v48  ;;  %v1252_v51 = vpop.f32.mrb[6].mxu0  ;;  %v608_v52 = vpack.c.bf16 %v593_v46, %v592_v45 }
 0x184   : > { %v582_v53 = vmul.f32 0.2, %v538_v47  ;;  %v541_v54 = vadd.f32 %v1252_v51, %v1939_v29  ;;  %v532_v55 = vpop.f32.mrb[7].mxu0 }
 0x185   : > { %v580_v56 = vmul.f32 0.2, %v530_v50  ;;  %v533_v57 = vadd.f32 %v1939_v29, %v532_v55  ;;  %1277 = vmatprep.mubr.bf16.mxu1 %v608_v52 }
 0x186   : > { %v583_v58 = vmul.f32 0.2, %v541_v54  ;;  %1278 = vmatmul.mubr.bf16.vlgmr.msra.gmra.mrb[0].mxu1 %v609_v49  ;;  %v598_v60 = vmax.f32 %v538_v47, %v582_v53 }
 0x187   : > { %v581_v59 = vmul.f32 0.2, %v533_v57  ;;  %1333 = vmatpush3.bf16.msra.mxu1 %v1446_v24  ;;  %v596_v62 = vmax.f32 %v530_v50, %v580_v56 }
 0x188   : > { %v599_v61 = vmax.f32 %v541_v54, %v583_v58  ;;  %1326 = vmatprep.subr.bf16.mxu1 %v1447_v25 }
 0x189   : > { %v597_v63 = vmax.f32 %v533_v57, %v581_v59  ;;  %v1255_v0 = vpop.f32.mrb[8].mxu0 }
 0x18a   : > { %v554_v1 = vadd.f32 %v1255_v0, %v1939_v29  ;;  %v545_v2 = vpop.f32.mrb[9].mxu0  ;;  %v611_v3 = vpack.c.bf16 %v599_v61, %v598_v60 }
 0x18b   : > { %v546_v4 = vadd.f32 %v1939_v29, %v545_v2  ;;  %v1256_v5 = vpop.f32.mrb[10].mxu0  ;;  %v610_v6 = vpack.c.bf16 %v597_v63, %v596_v62  ;;  %1334 = vmatpush3.bf16.msra.mxu1 %v1447_v25 }
 0x18c   : > { %v586_v7 = vmul.f32 0.2, %v554_v1  ;;  %v557_v8 = vadd.f32 %v1256_v5, %v1939_v29  ;;  %v548_v9 = vpop.f32.mrb[11].mxu0  ;;  %1327 = vmatprep.subr.bf16.mxu1 %v1924_v26 }
 0x18d   : > { %v584_v10 = vmul.f32 0.2, %v546_v4  ;;  %v549_v11 = vadd.f32 %v1939_v29, %v548_v9  ;;  %1281 = vmatprep.mubr.bf16.mxu1 %v610_v6 }
 0x18e   : > { %v587_v12 = vmul.f32 0.2, %v557_v8  ;;  %1282 = vmatmul.mubr.bf16.gmra.mrb[4].mxu1 %v611_v3  ;;  %v602_v14 = vmax.f32 %v554_v1, %v586_v7 }
 0x18f   : > { %v585_v13 = vmul.f32 0.2, %v549_v11  ;;  %1335 = vmatpush3.bf16.msra.mxu1 %v1924_v26  ;;  %v600_v16 = vmax.f32 %v546_v4, %v584_v10 }
 0x190   : > { %v603_v15 = vmax.f32 %v557_v8, %v587_v12  ;;  %1328 = vmatprep.subr.bf16.mxu1 %v1927_v27 }
 0x191   : > { %v601_v17 = vmax.f32 %v549_v11, %v585_v13  ;;  %v1259_v18 = vpop.f32.mrb[12].mxu0 }
 0x192   : > { %v570_v19 = vadd.f32 %v1259_v18, %v1939_v29  ;;  %v561_v20 = vpop.f32.mrb[13].mxu0  ;;  %v613_v21 = vpack.c.bf16 %v603_v15, %v602_v14 }
 0x193   : > { %v562_v22 = vadd.f32 %v1939_v29, %v561_v20  ;;  %v1260_v23 = vpop.f32.mrb[14].mxu0  ;;  %v612_v24 = vpack.c.bf16 %v601_v17, %v600_v16  ;;  %1336 = vmatpush3.bf16.msra.mxu1 %v1927_v27 }
 0x194   : > { %v590_v25 = vmul.f32 0.2, %v570_v19  ;;  %v573_v26 = vadd.f32 %v1260_v23, %v1939_v29  ;;  %v564_v30 = vpop.f32.mrb[15].mxu0  ;;  %1329 = vmatprep.subr.bf16.mxu1 %v1931_v28 }
 0x195   : > { %v588_v31 = vmul.f32 0.2, %v562_v22  ;;  %v565_v32 = vadd.f32 %v1939_v29, %v564_v30  ;;  %1285 = vmatprep.mubr.bf16.mxu1 %v612_v24  ;;  %v1452_v29 = vld [vmem:[#allocation8 + $0x30] sm:$0xff]  }
 0x196   : > { %v591_v33 = vmul.f32 0.2, %v573_v26  ;;  %1286 = vmatmul.mubr.bf16.gmra.mrb[8].mxu1 %v613_v21  ;;  %v606_v35 = vmax.f32 %v570_v19, %v590_v25  ;;  %1305 = vmatprep.subr.bf16.mxu0 %v1452_v29 }
 0x197   : > { %v589_v34 = vmul.f32 0.2, %v565_v32  ;;  %1337 = vmatpush3.bf16.msra.mxu1 %v1931_v28  ;;  %v604_v37 = vmax.f32 %v562_v22, %v588_v31  ;;  %1306 = vmatpush3.bf16.msra.mxu0 %v1452_v29  ;;  %v1966_v28 = vld [vmem:[%s2061_s4] ss:$0 sm:$0xff] }
 0x198   : > { %v607_v36 = vmax.f32 %v573_v26, %v591_v33  ;;  %1330 = vmatprep.subr.bf16.mxu1 %v1451_v40  ;;  %1307 = vmatprep.subr.bf16.mxu0 %v1453_v41 }
 0x199   : > { %v605_v38 = vmax.f32 %v565_v32, %v589_v34 }
 0x19a   : > { %v615_v27 = vpack.c.bf16 %v607_v36, %v606_v35 }
 0x19b   : > { %v614_v39 = vpack.c.bf16 %v605_v38, %v604_v37  ;;  %1338 = vmatpush3.bf16.msra.mxu1 %v1451_v40  ;;  %1308 = vmatpush3.bf16.msra.mxu0 %v1453_v41 }
 0x19c   : > { %1331 = vmatprep.subr.bf16.mxu1 %v1452_v29 }
 0x19d   : > { %1289 = vmatprep.mubr.bf16.mxu1 %v614_v39 }
 0x19e   : > { %1290 = vmatmul.mubr.bf16.gmra.mrb[12].mxu1 %v615_v27 }
 0x19f   : > { %1339 = vmatpush3.bf16.msra.mxu1 %v1452_v29 }
 0x1a0   : > { %1332 = vmatprep.subr.bf16.mxu1 %v1453_v41 }
 0x1a3   : > { %1340 = vmatpush3.bf16.msra.mxu1 %v1453_v41 }
 0x259   : > { %v1279_v42 = vpop.f32.mrb[0].mxu1 }
 0x25a   : > { %v730_v43 = vadd.f32 %v1279_v42, %v1966_v28  ;;  %v721_v44 = vpop.f32.mrb[1].mxu1 }
 0x25b   : > { %v722_v45 = vadd.f32 %v1966_v28, %v721_v44  ;;  %v1280_v46 = vpop.f32.mrb[2].mxu1 }
 0x25c   : > { %v786_v47 = vmul.f32 0.2, %v730_v43  ;;  %v733_v48 = vadd.f32 %v1280_v46, %v1966_v28  ;;  %v724_v49 = vpop.f32.mrb[3].mxu1 }
 0x25d   : > { %v784_v50 = vmul.f32 0.2, %v722_v45  ;;  %v725_v51 = vadd.f32 %v1966_v28, %v724_v49 }
 0x25e   : > { %v787_v52 = vmul.f32 0.2, %v733_v48  ;;  %v802_v54 = vmax.f32 %v730_v43, %v786_v47 }
 0x25f   : > { %v785_v53 = vmul.f32 0.2, %v725_v51  ;;  %v800_v56 = vmax.f32 %v722_v45, %v784_v50 }
 0x260   : > { %v803_v55 = vmax.f32 %v733_v48, %v787_v52 }
 0x261   : > { %v801_v57 = vmax.f32 %v725_v51, %v785_v53  ;;  %v1283_v58 = vpop.f32.mrb[4].mxu1  ;;  %v1165_v51 = vld [vmem:[%s2063_s6] ss:$0 sm:$0xff] }
 0x262   : > { %v817_v59 = vpack.c.bf16 %v803_v55, %v802_v54  ;;  %v746_v60 = vadd.f32 %v1283_v58, %v1966_v28  ;;  %v737_v61 = vpop.f32.mrb[5].mxu1 }
 0x263   : > { %v738_v62 = vadd.f32 %v1966_v28, %v737_v61  ;;  %v1284_v63 = vpop.f32.mrb[6].mxu1  ;;  %v816_v0 = vpack.c.bf16 %v801_v57, %v800_v56 }
 0x264   : > { %v790_v1 = vmul.f32 0.2, %v746_v60  ;;  %v749_v2 = vadd.f32 %v1284_v63, %v1966_v28  ;;  %v740_v3 = vpop.f32.mrb[7].mxu1 }
 0x265   : > { %v788_v4 = vmul.f32 0.2, %v738_v62  ;;  %v741_v5 = vadd.f32 %v1966_v28, %v740_v3  ;;  %1309 = vmatprep.mubr.bf16.mxu0 %v816_v0 }
 0x266   : > { %v791_v6 = vmul.f32 0.2, %v749_v2  ;;  %1310 = vmatmul.mubr.bf16.vlgmr.msra.gmra.mrb[16].mxu0 %v817_v59  ;;  %v806_v8 = vmax.f32 %v746_v60, %v790_v1 }
 0x267   : > { %v789_v7 = vmul.f32 0.2, %v741_v5  ;;  %v804_v10 = vmax.f32 %v738_v62, %v788_v4 }
 0x268   : > { %v807_v9 = vmax.f32 %v749_v2, %v791_v6 }
 0x269   : > { %v805_v11 = vmax.f32 %v741_v5, %v789_v7  ;;  %v1287_v12 = vpop.f32.mrb[8].mxu1 }
 0x26a   : > { %v762_v13 = vadd.f32 %v1287_v12, %v1966_v28  ;;  %v753_v14 = vpop.f32.mrb[9].mxu1  ;;  %v819_v15 = vpack.c.bf16 %v807_v9, %v806_v8 }
 0x26b   : > { %v754_v16 = vadd.f32 %v1966_v28, %v753_v14  ;;  %v1288_v17 = vpop.f32.mrb[10].mxu1  ;;  %v818_v18 = vpack.c.bf16 %v805_v11, %v804_v10 }
 0x26c   : > { %v794_v19 = vmul.f32 0.2, %v762_v13  ;;  %v765_v20 = vadd.f32 %v1288_v17, %v1966_v28  ;;  %v756_v21 = vpop.f32.mrb[11].mxu1 }
 0x26d   : > { %v792_v22 = vmul.f32 0.2, %v754_v16  ;;  %v757_v23 = vadd.f32 %v1966_v28, %v756_v21  ;;  %1313 = vmatprep.mubr.bf16.mxu0 %v818_v18 }
 0x26e   : > { %v795_v24 = vmul.f32 0.2, %v765_v20  ;;  %1314 = vmatmul.mubr.bf16.gmra.mrb[20].mxu0 %v819_v15  ;;  %v810_v26 = vmax.f32 %v762_v13, %v794_v19 }
 0x26f   : > { %v793_v25 = vmul.f32 0.2, %v757_v23  ;;  %v808_v31 = vmax.f32 %v754_v16, %v792_v22 }
 0x270   : > { %v811_v30 = vmax.f32 %v765_v20, %v795_v24 }
 0x271   : > { %v809_v32 = vmax.f32 %v757_v23, %v793_v25  ;;  %v1291_v33 = vpop.f32.mrb[12].mxu1 }
 0x272   : > { %v821_v34 = vpack.c.bf16 %v811_v30, %v810_v26  ;;  %v778_v35 = vadd.f32 %v1291_v33, %v1966_v28  ;;  %v769_v36 = vpop.f32.mrb[13].mxu1 }
 0x273   : > { %v770_v37 = vadd.f32 %v1966_v28, %v769_v36  ;;  %v1292_v38 = vpop.f32.mrb[14].mxu1  ;;  %v820_v27 = vpack.c.bf16 %v809_v32, %v808_v31 }
 0x274   : > { %v798_v39 = vmul.f32 0.2, %v778_v35  ;;  %v781_v40 = vadd.f32 %v1292_v38, %v1966_v28  ;;  %v772_v29 = vpop.f32.mrb[15].mxu1 }
 0x275   : > { %v796_v41 = vmul.f32 0.2, %v770_v37  ;;  %v773_v42 = vadd.f32 %v1966_v28, %v772_v29  ;;  %1317 = vmatprep.mubr.bf16.mxu1 %v820_v27 }
 0x276   : > { %v799_v43 = vmul.f32 0.2, %v781_v40  ;;  %1318 = vmatmul.mubr.bf16.vlgmr.msra.gmra.mrb[16].mxu1 %v821_v34  ;;  %v814_v45 = vmax.f32 %v778_v35, %v798_v39 }
 0x277   : > { %v797_v44 = vmul.f32 0.2, %v773_v42  ;;  %v812_v47 = vmax.f32 %v770_v37, %v796_v41 }
 0x278   : > { %v815_v46 = vmax.f32 %v781_v40, %v799_v43 }
 0x279   : > { %v813_v48 = vmax.f32 %v773_v42, %v797_v44 }
 0x27a   : > { %v823_v49 = vpack.c.bf16 %v815_v46, %v814_v45 }
 0x27b   : > { %v822_v50 = vpack.c.bf16 %v813_v48, %v812_v47 }
 0x27d   : > { %1321 = vmatprep.mubr.bf16.mxu1 %v822_v50 }
 0x27e   : > { %1322 = vmatmul.mubr.bf16.gmra.mrb[20].mxu1 %v823_v49 }
 0x339   : > { %v1311_v52 = vpop.f32.mrb[16].mxu0 }
 0x33a   : > { %v938_v53 = vadd.f32 %v1311_v52, %v1165_v51  ;;  %v929_v28 = vpop.f32.mrb[17].mxu0 }
 0x33b   : > { %v930_v54 = vadd.f32 %v1165_v51, %v929_v28  ;;  %v1312_v55 = vpop.f32.mrb[18].mxu0 }
 0x33c   : > { %994 = vst [vmem:[%s1988_s12 + $0x10] sm:$0xff] %v938_v53  ;;  %v941_v56 = vadd.f32 %v1312_v55, %v1165_v51  ;;  %v932_v57 = vpop.f32.mrb[19].mxu0 }
 0x33d   : > { %992 = vst [vmem:[%s1988_s12] sm:$0xff] %v930_v54  ;;  %v933_v58 = vadd.f32 %v1165_v51, %v932_v57 }
 0x33e   : > { %995 = vst [vmem:[%s1988_s12 + $0x18] sm:$0xff] %v941_v56 }
 0x33f   : > { %993 = vst [vmem:[%s1988_s12 + $0x8] sm:$0xff] %v933_v58 }
 0x341   : > { %v1315_v59 = vpop.f32.mrb[20].mxu0 }
 0x342   : > { %v954_v60 = vadd.f32 %v1315_v59, %v1165_v51  ;;  %v945_v61 = vpop.f32.mrb[21].mxu0 }
 0x343   : > { %v946_v62 = vadd.f32 %v1165_v51, %v945_v61  ;;  %v1316_v63 = vpop.f32.mrb[22].mxu0 }
 0x344   : > { %998 = vst [vmem:[%s1988_s12 + $0x30] sm:$0xff] %v954_v60  ;;  %v957_v0 = vadd.f32 %v1316_v63, %v1165_v51  ;;  %v948_v1 = vpop.f32.mrb[23].mxu0 }
 0x345   : > { %996 = vst [vmem:[%s1988_s12 + $0x20] sm:$0xff] %v946_v62  ;;  %v949_v2 = vadd.f32 %v1165_v51, %v948_v1 }
 0x346   : > { %999 = vst [vmem:[%s1988_s12 + $0x38] sm:$0xff] %v957_v0 }
 0x347   : > { %997 = vst [vmem:[%s1988_s12 + $0x28] sm:$0xff] %v949_v2 }
 0x349   : > { %v1319_v3 = vpop.f32.mrb[16].mxu1 }
 0x34a   : > { %v970_v4 = vadd.f32 %v1319_v3, %v1165_v51  ;;  %v961_v5 = vpop.f32.mrb[17].mxu1 }
 0x34b   : > { %v962_v6 = vadd.f32 %v1165_v51, %v961_v5  ;;  %v1320_v7 = vpop.f32.mrb[18].mxu1 }
 0x34c   : > { %1002 = vst [vmem:[%s1988_s12 + $0x50] sm:$0xff] %v970_v4  ;;  %v973_v8 = vadd.f32 %v1320_v7, %v1165_v51  ;;  %v964_v9 = vpop.f32.mrb[19].mxu1 }
 0x34d   : > { %1000 = vst [vmem:[%s1988_s12 + $0x40] sm:$0xff] %v962_v6  ;;  %v965_v10 = vadd.f32 %v1165_v51, %v964_v9 }
 0x34e   : > { %1003 = vst [vmem:[%s1988_s12 + $0x58] sm:$0xff] %v973_v8 }
 0x34f   : > { %1001 = vst [vmem:[%s1988_s12 + $0x48] sm:$0xff] %v965_v10 }
 0x351   : > { %v1323_v11 = vpop.f32.mrb[20].mxu1 }
 0x352   : > { %v986_v12 = vadd.f32 %v1323_v11, %v1165_v51  ;;  %v977_v13 = vpop.f32.mrb[21].mxu1 }
 0x353   : > { %v978_v14 = vadd.f32 %v1165_v51, %v977_v13  ;;  %v1324_v15 = vpop.f32.mrb[22].mxu1 }
 0x354   : > { %1006 = vst [vmem:[%s1988_s12 + $0x70] sm:$0xff] %v986_v12  ;;  %v989_v16 = vadd.f32 %v1324_v15, %v1165_v51  ;;  %v980_v17 = vpop.f32.mrb[23].mxu1 }
 0x355   : > { %1004 = vst [vmem:[%s1988_s12 + $0x60] sm:$0xff] %v978_v14  ;;  %v981_v18 = vadd.f32 %v1165_v51, %v980_v17 }
 0x356   : > { %1007 = vst [vmem:[%s1988_s12 + $0x78] sm:$0xff] %v989_v16 }
 0x357   : > { %1005 = vst [vmem:[%s1988_s12 + $0x68] sm:$0xff] %v981_v18 }
 0x358   : > { %1581 = shalt.err (!%p1578_p4)
}
 0x359   : > { %s1582_s15 = scalar_lea.hbm %s2008_s11, 2048  ;;  %s1586_s8 = scalar_lea.hbm %s2064_s7, 4096 }
 0x35a   : > { %p1583_p9 = scmp.ne.s32.totalorder %s2008_s11, %s1582_s15  ;;  %p1587_p8 = scmp.lt.u32.totalorder %s2008_s11, %s2064_s7 }
 0x35b   : > { %p1588_p13 = scmp.lt.u32.totalorder %s1586_s8, %s1582_s15  ;;  %p1590_p10 = scmp.lt.u32.totalorder %s1582_s15, %s2008_s11 }
 0x35c   : > { %p1584_p0 = pnand %p1583_p9, %p1847_p5 }
 0x35d   : > { %p1589_p6 = por %p1588_p13, %p1587_p8 }
 0x35e   : > { %p1585_p11 = pneg %p1584_p0 }
 0x35f   : > { %p1591_p3 = por %p1590_p10, %p1589_p6 }
 0x361   : > { %p1592_p7 = pnand %p1591_p3, %p1585_p11 }
 0x363   : > { %1595 = shalt.err (!%p1592_p7)
}
 0x364   : > { %s1651_s29 = smov 128   ;;  %s1652_s23 = smov 8  }
 0x365   : > { %1355 = dma.vmem_to_hbm [thread:$0]  (%p1847_p5), %s2010_s16, 2048, %s2008_s11, %s1009_s28, %s1651_s29, %s1651_s29, %s1652_s23  }
 0x366 PF: > { %s2084_s20 = sld [smem:[#allocation15_spill]]  ;;  %s1037_s30 = sand.u32 1, %s1630_s24  }
 0x367   : > { %p2086_p1 = scmp.ge.s32.totalorder %s1642_s27, 2  ;;  %s1038_s9 = scalar_lea.sflag [#allocation4], %s1037_s30 }
 0x36c   : > { %p2085_p12 = scmp.ne.s32.totalorder %s2084_s20, 0 }
 0x36e   : > { %p1372_p2 = pnand %p2086_p1, %p2085_p12 }
 0x370   : > { %1625 = dma.done.wait (!%p1372_p2), %s1038_s9, 2048  }
 0x371   : > { %1627 = vsyncadd (!%p1372_p2), %s1038_s9, 4294965248  ;;  %p22_p4 = scmp.ge.s32.totalorder %s1833_s22, 4   ;;  %s2087_s24 = smov %s1634_s25 }
 0x372   : > { %s2088_s25 = smov %s1638_s26  ;;  %s2089_s26 = smov %s1843_s18 }
 0x373   : > { %s2090_s27 = smov %s1833_s22  ;;  %24 = sbr.rel (!%p22_p4) target bundleno = 7 (0x7), region = 105 }
 0x37a   :  { %1043 = vsyncpa [#allocation3], 1 }
 0x37b   :  { %1045 = vsyncpa [#allocation3 + $0x1], 1 }
 0x37c   :  { %1046 = vsyncpa [#allocation6], 1 }
 0x37d   :  { %1047 = vsyncpa [#allocation9], 1 }
 0x37e   :  { %1048 = vsyncpa [#allocation4], 1 }
 0x37f   :  { %1050 = vsyncpa [#allocation4 + $0x1], 1 }

</bundles_post_ra>
